<compile_context>
chip_gen: v5e
topology: v5e:2x2
jax: 0.10.0
libtpu: 0.0.40
codegen_flags: <defaults>
</compile_context>

<pallas_src>
import functools

import jax
import jax.numpy as jnp
from jax.experimental import pallas as pl
from jax.experimental.pallas import tpu as pltpu


def _round_up(x: int, m: int) -> int:
    return (x + m - 1) // m * m


# ---------------------------------------------------------------------------
# Fused Pallas kernel: the entire MLP applied to one batch tile.
# refs = (w_0, b_0, w_1, b_1, ..., w_{L-1}, b_{L-1}, out_ref)
# ---------------------------------------------------------------------------
def _fused_mlp_kernel(x_ref, *refs, relu_flags):
    out_ref = refs[-1]
    h = x_ref[...]  # (TILE_M, D_in_pad) f32
    for li, relu in enumerate(relu_flags):
        w_ref = refs[2 * li]      # (K_pad, N_pad) bf16, resident in VMEM
        b_ref = refs[2 * li + 1]  # (1, N_pad)     f32
        y = jnp.dot(h.astype(jnp.bfloat16), w_ref[...],
                    preferred_element_type=jnp.float32)
        y = y + b_ref[...]        # broadcast over the batch tile (VPU, f32)
        if relu:
            y = jnp.maximum(y, 0.0)
        h = y
    out_ref[...] = h.astype(out_ref.dtype)


# ---------------------------------------------------------------------------
# Wrapper: pack (pad + bf16-cast) parameters once, build a jitted forward fn.
# ---------------------------------------------------------------------------
def make_mlp_forward(params, *, max_batch_tile: int = 256):
    """Return a jitted forward(x) implementing MLP.forward with a fused kernel."""
    if not params:
        # hidden_sizes=() and output_dim=0: the model is identity on flatten(1).
        return jax.jit(lambda x: jnp.asarray(x, jnp.float32).reshape(x.shape[0], -1))

    relu_flags = tuple(bool(layer["relu"]) for layer in params)
    in_dim = params[0]["w"].shape[0]
    out_dim = params[-1]["w"].shape[1]
    in_dim_pad = _round_up(in_dim, 128)
    out_dim_pad = _round_up(out_dim, 128)

    # Pad every layer's feature dims to lane-dense multiples of 128; cast
    # weights to bf16 for the MXU (biases stay f32, added post-accumulation).
    packed = []
    for layer in params:
        k, n = layer["w"].shape
        kp, npad = _round_up(k, 128), _round_up(n, 128)
        w = (jnp.zeros((kp, npad), jnp.float32)
             .at[:k, :n].set(layer["w"]).astype(jnp.bfloat16))
        b = jnp.zeros((1, npad), jnp.float32).at[:, :n].set(layer["b"])
        packed.append((w, b))

    kernel = functools.partial(_fused_mlp_kernel, relu_flags=relu_flags)

    @jax.jit
    def forward(x):
        x = jnp.asarray(x, dtype=jnp.float32)
        x = x.reshape(x.shape[0], -1)  # torch.flatten(1)
        b_sz, d = x.shape
        assert d == in_dim, (d, in_dim)

        # Batch tile: multiple of 8 (sublane), capped so the double-buffered
        # x / out tiles plus all resident weights fit comfortably within the
        # 32 MiB scoped VMEM limit on every TPU generation (incl. v7x 64 MiB).
        tile_m = min(max_batch_tile, _round_up(b_sz, 8))
        b_pad = _round_up(b_sz, tile_m)
        x_pad = jnp.zeros((b_pad, in_dim_pad), jnp.float32).at[:b_sz, :d].set(x)

        in_specs = [pl.BlockSpec((tile_m, in_dim_pad), lambda i: (i, 0))]
        operands = [x_pad]
        for w, b in packed:
            kp, npad = w.shape
            # Constant block index -> weights/biases are DMA'd once and kept
            # resident across all batch-grid steps.
            in_specs.append(pl.BlockSpec((kp, npad), lambda i: (0, 0)))
            in_specs.append(pl.BlockSpec((1, npad), lambda i: (0, 0)))
            operands.append(w)
            operands.append(b)

        out_pad = pl.pallas_call(
            kernel,
            out_shape=jax.ShapeDtypeStruct((b_pad, out_dim_pad), jnp.float32),
            grid=(b_pad // tile_m,),
            in_specs=in_specs,
            out_specs=pl.BlockSpec((tile_m, out_dim_pad), lambda i: (i, 0)),
            compiler_params=pltpu.CompilerParams(
                dimension_semantics=("parallel",),      # megacore on v7x
                vmem_limit_bytes=32 * 1024 * 1024,      # safe on v5e/v6e/v7x
            ),
        )(*operands)

        return out_pad[:b_sz, :out_dim]

    return forward


# ---------------------------------------------------------------------------
# Parameter construction (deterministic, mirrors nn.Linear default init:
# uniform(-1/sqrt(in_dim), 1/sqrt(in_dim)) for both weight and bias).
# ---------------------------------------------------------------------------
def init_mlp_params(key, input_dim, hidden_sizes, output_dim):
    layer_dims = [input_dim] + list(hidden_sizes)
    layers = []
    for in_dim, out_dim in zip(layer_dims[:-1], layer_dims[1:]):
        key, wk, bk = jax.random.split(key, 3)
        bound = 1.0 / float(in_dim) ** 0.5
        w = jax.random.uniform(wk, (in_dim, out_dim), jnp.float32, -bound, bound)
        b = jax.random.uniform(bk, (1, out_dim), jnp.float32, -bound, bound)
        layers.append({"w": w, "b": b, "relu": True})
    if output_dim > 0:
        in_dim = layer_dims[-1]
        key, wk, bk = jax.random.split(key, 3)
        bound = 1.0 / float(in_dim) ** 0.5
        w = jax.random.uniform(wk, (in_dim, output_dim), jnp.float32, -bound, bound)
        b = jax.random.uniform(bk, (1, output_dim), jnp.float32, -bound, bound)
        layers.append({"w": w, "b": b, "relu": False})
    return layers


# ---------------------------------------------------------------------------
# Pure-JAX reference using the same bf16-input / f32-accumulate matmul math.
# ---------------------------------------------------------------------------
def mlp_reference(params, x):
    x = jnp.asarray(x, jnp.float32).reshape(x.shape[0], -1)
    for layer in params:
        y = jnp.dot(x.astype(jnp.bfloat16), layer["w"].astype(jnp.bfloat16),
                    preferred_element_type=jnp.float32) + layer["b"]
        if layer["relu"]:
            y = jnp.maximum(y, 0.0)
        x = y
    return x


if __name__ == "__main__":
    key = jax.random.PRNGKey(0)
    k_x, k_p = jax.random.split(key)

    # MLP(input_dim=4*16*16, hidden_sizes=(32, 32), output_dim=8)
    batch, channels, spatial = 2, 4, 16
    input_dim = channels * spatial * spatial  # 1024
    hidden_sizes = (32, 32)
    output_dim = 8

    x = jax.random.normal(k_x, (batch, channels, spatial, spatial), jnp.float32)
    params = init_mlp_params(k_p, input_dim, hidden_sizes, output_dim)

    forward = make_mlp_forward(params)
    out = forward(x)
    out = jax.block_until_ready(out)

    ref = mlp_reference(params, x)
    assert out.shape == (batch, output_dim), out.shape
    assert jnp.allclose(out, ref, atol=2e-3, rtol=2e-3), "mismatch vs reference"

    print("KERNEL_OK")
</pallas_src>

<mosaic_0001>
module attributes {stable_mosaic.version = 11 : i64} {
  func.func @_fused_mlp_kernel(%arg0: i32, %arg1: memref<8x1024xf32, #tpu.memory_space<vmem>>, %arg2: memref<1024x128xbf16, #tpu.memory_space<vmem>>, %arg3: memref<1x128xf32, #tpu.memory_space<vmem>>, %arg4: memref<128x128xbf16, #tpu.memory_space<vmem>>, %arg5: memref<1x128xf32, #tpu.memory_space<vmem>>, %arg6: memref<128x128xbf16, #tpu.memory_space<vmem>>, %arg7: memref<1x128xf32, #tpu.memory_space<vmem>>, %arg8: memref<8x128xf32, #tpu.memory_space<vmem>>) attributes {dimension_semantics = [#tpu.dimension_semantics<parallel>], iteration_bounds = array<i64: 1>, scalar_prefetch = 0 : i64, scratch_operands = 0 : i64, tpu.core_type = #tpu.core_type<tc>, window_params = [{transform_indices = @transform_0, window_bounds = array<i64: 8, 1024>}, {pipeline_mode = #tpu.pipeline_mode<synchronous>, transform_indices = @transform_1, window_bounds = array<i64: 1024, 128>}, {pipeline_mode = #tpu.pipeline_mode<synchronous>, transform_indices = @transform_2, window_bounds = array<i64: 1, 128>}, {pipeline_mode = #tpu.pipeline_mode<synchronous>, transform_indices = @transform_3, window_bounds = array<i64: 128, 128>}, {pipeline_mode = #tpu.pipeline_mode<synchronous>, transform_indices = @transform_4, window_bounds = array<i64: 1, 128>}, {pipeline_mode = #tpu.pipeline_mode<synchronous>, transform_indices = @transform_5, window_bounds = array<i64: 128, 128>}, {pipeline_mode = #tpu.pipeline_mode<synchronous>, transform_indices = @transform_6, window_bounds = array<i64: 1, 128>}, {transform_indices = @transform_7, window_bounds = array<i64: 8, 128>}]} {
    %c0 = arith.constant 0 : index
    %c0_0 = arith.constant 0 : index
    %0 = vector.load %arg1[%c0, %c0_0] : memref<8x1024xf32, #tpu.memory_space<vmem>>, vector<8x1024xf32>
    %1 = arith.truncf %0 : vector<8x1024xf32> to vector<8x1024xbf16>
    %c0_1 = arith.constant 0 : index
    %c0_2 = arith.constant 0 : index
    %2 = vector.load %arg2[%c0_1, %c0_2] : memref<1024x128xbf16, #tpu.memory_space<vmem>>, vector<1024x128xbf16>
    %cst = arith.constant dense<0.000000e+00> : vector<8x128xf32>
    %3 = tpu.matmul %1, %2, %cst {dimension_numbers = #tpu.dot_dimension_numbers<[1], [0], [0], [1], [0, 0, 1, 1], [], []>} : vector<8x1024xbf16>, vector<1024x128xbf16>, vector<8x128xf32> -> vector<8x128xf32>
    %c0_3 = arith.constant 0 : index
    %c0_4 = arith.constant 0 : index
    %4 = vector.load %arg3[%c0_3, %c0_4] : memref<1x128xf32, #tpu.memory_space<vmem>>, vector<1x128xf32>
    %5 = vector.broadcast %4 : vector<1x128xf32> to vector<8x128xf32>
    %6 = arith.addf %3, %5 : vector<8x128xf32>
    %cst_5 = arith.constant 0.000000e+00 : f32
    %7 = vector.broadcast %cst_5 : f32 to vector<8x128xf32>
    %8 = arith.maximumf %6, %7 : vector<8x128xf32>
    %9 = arith.truncf %8 : vector<8x128xf32> to vector<8x128xbf16>
    %c0_6 = arith.constant 0 : index
    %c0_7 = arith.constant 0 : index
    %10 = vector.load %arg4[%c0_6, %c0_7] : memref<128x128xbf16, #tpu.memory_space<vmem>>, vector<128x128xbf16>
    %cst_8 = arith.constant dense<0.000000e+00> : vector<8x128xf32>
    %11 = tpu.matmul %9, %10, %cst_8 {dimension_numbers = #tpu.dot_dimension_numbers<[1], [0], [0], [1], [0, 0, 1, 1], [], []>} : vector<8x128xbf16>, vector<128x128xbf16>, vector<8x128xf32> -> vector<8x128xf32>
    %c0_9 = arith.constant 0 : index
    %c0_10 = arith.constant 0 : index
    %12 = vector.load %arg5[%c0_9, %c0_10] : memref<1x128xf32, #tpu.memory_space<vmem>>, vector<1x128xf32>
    %13 = vector.broadcast %12 : vector<1x128xf32> to vector<8x128xf32>
    %14 = arith.addf %11, %13 : vector<8x128xf32>
    %cst_11 = arith.constant 0.000000e+00 : f32
    %15 = vector.broadcast %cst_11 : f32 to vector<8x128xf32>
    %16 = arith.maximumf %14, %15 : vector<8x128xf32>
    %17 = arith.truncf %16 : vector<8x128xf32> to vector<8x128xbf16>
    %c0_12 = arith.constant 0 : index
    %c0_13 = arith.constant 0 : index
    %18 = vector.load %arg6[%c0_12, %c0_13] : memref<128x128xbf16, #tpu.memory_space<vmem>>, vector<128x128xbf16>
    %cst_14 = arith.constant dense<0.000000e+00> : vector<8x128xf32>
    %19 = tpu.matmul %17, %18, %cst_14 {dimension_numbers = #tpu.dot_dimension_numbers<[1], [0], [0], [1], [0, 0, 1, 1], [], []>} : vector<8x128xbf16>, vector<128x128xbf16>, vector<8x128xf32> -> vector<8x128xf32>
    %c0_15 = arith.constant 0 : index
    %c0_16 = arith.constant 0 : index
    %20 = vector.load %arg7[%c0_15, %c0_16] : memref<1x128xf32, #tpu.memory_space<vmem>>, vector<1x128xf32>
    %21 = vector.broadcast %20 : vector<1x128xf32> to vector<8x128xf32>
    %22 = arith.addf %19, %21 : vector<8x128xf32>
    %c0_17 = arith.constant 0 : index
    %c0_18 = arith.constant 0 : index
    %23 = vector.load %arg8[%c0_17, %c0_18] : memref<8x128xf32, #tpu.memory_space<vmem>>, vector<8x128xf32>
    tpu.vector_store %arg8[%c0_17, %c0_18], %22 {strides = array<i32>} : memref<8x128xf32, #tpu.memory_space<vmem>>, vector<8x128xf32>,
    return
  }
  func.func @transform_0(%arg0: i32) -> (i32, i32) {
    %c0_i32 = arith.constant 0 : i32
    %c0_i32_0 = arith.constant 0 : i32
    return %arg0, %c0_i32 : i32, i32
  }
  func.func @transform_1(%arg0: i32) -> (i32, i32) {
    %c0_i32 = arith.constant 0 : i32
    %c0_i32_0 = arith.constant 0 : i32
    %c0_i32_1 = arith.constant 0 : i32
    return %c0_i32, %c0_i32_0 : i32, i32
  }
  func.func @transform_2(%arg0: i32) -> (i32, i32) {
    %c0_i32 = arith.constant 0 : i32
    %c0_i32_0 = arith.constant 0 : i32
    %c0_i32_1 = arith.constant 0 : i32
    return %c0_i32, %c0_i32_0 : i32, i32
  }
  func.func @transform_3(%arg0: i32) -> (i32, i32) {
    %c0_i32 = arith.constant 0 : i32
    %c0_i32_0 = arith.constant 0 : i32
    %c0_i32_1 = arith.constant 0 : i32
    return %c0_i32, %c0_i32_0 : i32, i32
  }
  func.func @transform_4(%arg0: i32) -> (i32, i32) {
    %c0_i32 = arith.constant 0 : i32
    %c0_i32_0 = arith.constant 0 : i32
    %c0_i32_1 = arith.constant 0 : i32
    return %c0_i32, %c0_i32_0 : i32, i32
  }
  func.func @transform_5(%arg0: i32) -> (i32, i32) {
    %c0_i32 = arith.constant 0 : i32
    %c0_i32_0 = arith.constant 0 : i32
    %c0_i32_1 = arith.constant 0 : i32
    return %c0_i32, %c0_i32_0 : i32, i32
  }
  func.func @transform_6(%arg0: i32) -> (i32, i32) {
    %c0_i32 = arith.constant 0 : i32
    %c0_i32_0 = arith.constant 0 : i32
    %c0_i32_1 = arith.constant 0 : i32
    return %c0_i32, %c0_i32_0 : i32, i32
  }
  func.func @transform_7(%arg0: i32) -> (i32, i32) {
    %c0_i32 = arith.constant 0 : i32
    %c0_i32_0 = arith.constant 0 : i32
    return %arg0, %c0_i32 : i32, i32
  }
}

</mosaic_0001>

<bundles_post_ra>
// kernel: forward.1
= control target key start
LH: loop header
LB: loop body
LE: loop exit
PB: predicated region body
PF: predicated region fallthrough
CT: control target
= control target key end

     0   :  { %12 = vsyncpa [#allocation3], 0  ;;  %s1282_s27 = smov [#allocation2]   ;;  %s1283_s29 = smov 64   ;;  %s1412_s0 = inlined_call_operand.vmem [shape: f32[8,1024], index: 0, kind: input, shape index: {}]   ;;  %s1413_s1 = inlined_call_operand.hbm [shape: bf16[1024,128], index: 1, kind: input, shape index: {}]   ;;  %s1414_s2 = inlined_call_operand.vmem [shape: f32[1,128], index: 2, kind: input, shape index: {}]   ;;  %s1415_s3 = inlined_call_operand.vmem [shape: bf16[128,128], index: 3, kind: input, shape index: {}]   ;;  %s1416_s4 = inlined_call_operand.vmem [shape: f32[1,128], index: 4, kind: input, shape index: {}]   ;;  %s1417_s5 = inlined_call_operand.vmem [shape: bf16[128,128], index: 5, kind: input, shape index: {}]   ;;  %s1418_s6 = inlined_call_operand.vmem [shape: f32[1,128], index: 6, kind: input, shape index: {}]   ;;  %s1419_s7 = inlined_call_operand.vmem [shape: f32[8,128], index: 7, kind: output, shape index: {}]  }
   0x1   :  { %s19_s26 = sshll.u32 %s1413_s1, 4  ;;  %s21_s28 = sshll.u32 %s1282_s27, 4  ;;  %s20_s26 = int_to_ptr.hbm [resolvable:$true] %s19_s26  ;;  %s22_s28 = int_to_ptr.vmem [resolvable:$true] %s21_s28 }
   0x2   :  { %s1284_s30 = smov 4  }
   0x3   :  { %27 = dma.hbm_to_vmem [thread:$0]  %s20_s26, 8192, %s22_s28, [#allocation3], %s1283_s29, %s1283_s29, %s1284_s30  }
   0x4   :  { %1280 = dma.done.wait [#allocation3], 8192  }
   0x5   :  { %1281 = vsyncadd [#allocation3], 4294959104  ;;  %v1177_v0 = vld [vmem:[#allocation2 + $0x38] sm:$0xff]  ;;  %v1176_v4 = vld [vmem:[#allocation2 + $0x30] sm:$0xff] }
   0x6   :  { %v1185_v1 = vld [vmem:[#allocation2 + $0x78] sm:$0xff]  ;;  %574 = vmatpush.bf16.msra.mxu0 %v1177_v0  ;;  %v1184_v5 = vld [vmem:[#allocation2 + $0x70] sm:$0xff]  ;;  %v1175_v8 = vld [vmem:[#allocation2 + $0x28] sm:$0xff] }
   0x7   :  { %v1193_v2 = vld [vmem:[#allocation2 + $0xb8] sm:$0xff]  ;;  %587 = vmatpush.bf16.msra.mxu1 %v1185_v1  ;;  %v1192_v6 = vld [vmem:[#allocation2 + $0xb0] sm:$0xff]  ;;  %v1183_v9 = vld [vmem:[#allocation2 + $0x68] sm:$0xff] }
   0x8   :  { %v1201_v3 = vld [vmem:[#allocation2 + $0xf8] sm:$0xff]  ;;  %600 = vmatpush.bf16.msra.mxu2 %v1193_v2  ;;  %v1200_v7 = vld [vmem:[#allocation2 + $0xf0] sm:$0xff]  ;;  %v1191_v10 = vld [vmem:[#allocation2 + $0xa8] sm:$0xff] }
   0x9   :  { %613 = vmatpush.bf16.msra.mxu3 %v1201_v3  ;;  %v1199_v11 = vld [vmem:[#allocation2 + $0xe8] sm:$0xff]  ;;  %v1174_v12 = vld [vmem:[#allocation2 + $0x20] sm:$0xff]  ;;  %v1173_v16 = vld [vmem:[#allocation2 + $0x18] sm:$0xff] }
   0xa   :  { %575 = vmatpush.bf16.msra.mxu0 %v1176_v4  ;;  %v1182_v13 = vld [vmem:[#allocation2 + $0x60] sm:$0xff]  ;;  %v1181_v17 = vld [vmem:[#allocation2 + $0x58] sm:$0xff]  ;;  %v1172_v20 = vld [vmem:[#allocation2 + $0x10] sm:$0xff] }
   0xb   :  { %588 = vmatpush.bf16.msra.mxu1 %v1184_v5  ;;  %v1190_v14 = vld [vmem:[#allocation2 + $0xa0] sm:$0xff]  ;;  %v1189_v18 = vld [vmem:[#allocation2 + $0x98] sm:$0xff]  ;;  %v1180_v21 = vld [vmem:[#allocation2 + $0x50] sm:$0xff] }
   0xc   :  { %601 = vmatpush.bf16.msra.mxu2 %v1192_v6  ;;  %v1198_v15 = vld [vmem:[#allocation2 + $0xe0] sm:$0xff]  ;;  %v1197_v19 = vld [vmem:[#allocation2 + $0xd8] sm:$0xff]  ;;  %v1188_v22 = vld [vmem:[#allocation2 + $0x90] sm:$0xff] }
   0xd   :  { %614 = vmatpush.bf16.msra.mxu3 %v1200_v7  ;;  %v1196_v23 = vld [vmem:[#allocation2 + $0xd0] sm:$0xff]  ;;  %v1171_v24 = vld [vmem:[#allocation2 + $0x8] sm:$0xff]  ;;  %v1170_v28 = vld [vmem:[#allocation2] sm:$0xff] }
   0xe   :  { %576 = vmatpush.bf16.msra.mxu0 %v1175_v8  ;;  %v1179_v25 = vld [vmem:[#allocation2 + $0x48] sm:$0xff]  ;;  %v1178_v29 = vld [vmem:[#allocation2 + $0x40] sm:$0xff]  ;;  %v1209_v32 = vld [vmem:[#allocation2 + $0x138] sm:$0xff] }
   0xf   :  { %589 = vmatpush.bf16.msra.mxu1 %v1183_v9  ;;  %v1187_v26 = vld [vmem:[#allocation2 + $0x88] sm:$0xff]  ;;  %v1186_v30 = vld [vmem:[#allocation2 + $0x80] sm:$0xff]  ;;  %v44_v33 = vld [vmem:[%s1412_s0 + $0x10] sm:$0xff] }
  0x10   :  { %602 = vmatpush.bf16.msra.mxu2 %v1191_v10  ;;  %v1195_v27 = vld [vmem:[#allocation2 + $0xc8] sm:$0xff]  ;;  %v1194_v31 = vld [vmem:[#allocation2 + $0xc0] sm:$0xff]  ;;  %v1217_v35 = vld [vmem:[#allocation2 + $0x178] sm:$0xff]  ;;  %v52_v40 = vpack.c.bf16 %v44_v33, %v44_v33 }
  0x11   :  { %615 = vmatpush.bf16.msra.mxu3 %v1199_v11  ;;  %v42_v34 = vld [vmem:[%s1412_s0] sm:$0xff]  ;;  %v45_v36 = vld [vmem:[%s1412_s0 + $0x18] sm:$0xff]  ;;  %v43_v37 = vld [vmem:[%s1412_s0 + $0x8] sm:$0xff] }
  0x12   :  { %577 = vmatpush.bf16.msra.mxu0 %v1174_v12  ;;  %v1225_v38 = vld [vmem:[#allocation2 + $0x1b8] sm:$0xff]  ;;  %v50_v41 = vpack.c.bf16 %v42_v34, %v42_v34  ;;  %v53_v42 = vpack.c.bf16 %v45_v36, %v45_v36  ;;  %v51_v43 = vpack.c.bf16 %v43_v37, %v43_v37  ;;  %v1208_v44 = vld [vmem:[#allocation2 + $0x130] sm:$0xff]  ;;  %v1207_v48 = vld [vmem:[#allocation2 + $0x128] sm:$0xff] }
  0x13   :  { %590 = vmatpush.bf16.msra.mxu1 %v1182_v13  ;;  %v1233_v39 = vld [vmem:[#allocation2 + $0x1f8] sm:$0xff]  ;;  %v1216_v45 = vld [vmem:[#allocation2 + $0x170] sm:$0xff]  ;;  %v1215_v49 = vld [vmem:[#allocation2 + $0x168] sm:$0xff] }
  0x14   :  { %603 = vmatpush.bf16.msra.mxu2 %v1190_v14  ;;  %v1224_v46 = vld [vmem:[#allocation2 + $0x1b0] sm:$0xff]  ;;  %v1223_v50 = vld [vmem:[#allocation2 + $0x1a8] sm:$0xff]  ;;  %v1206_v52 = vld [vmem:[#allocation2 + $0x120] sm:$0xff] }
  0x15   :  { %616 = vmatpush.bf16.msra.mxu3 %v1198_v15  ;;  %v1232_v47 = vld [vmem:[#allocation2 + $0x1f0] sm:$0xff]  ;;  %v1231_v51 = vld [vmem:[#allocation2 + $0x1e8] sm:$0xff]  ;;  %v1214_v53 = vld [vmem:[#allocation2 + $0x160] sm:$0xff] }
  0x16   :  { %578 = vmatpush.bf16.msra.mxu0 %v1173_v16  ;;  %v1222_v54 = vld [vmem:[#allocation2 + $0x1a0] sm:$0xff]  ;;  %v1205_v56 = vld [vmem:[#allocation2 + $0x118] sm:$0xff]  ;;  %v1204_v60 = vld [vmem:[#allocation2 + $0x110] sm:$0xff] }
  0x17   :  { %591 = vmatpush.bf16.msra.mxu1 %v1181_v17  ;;  %v1230_v55 = vld [vmem:[#allocation2 + $0x1e0] sm:$0xff]  ;;  %v1213_v57 = vld [vmem:[#allocation2 + $0x158] sm:$0xff]  ;;  %v1212_v61 = vld [vmem:[#allocation2 + $0x150] sm:$0xff] }
  0x18   :  { %604 = vmatpush.bf16.msra.mxu2 %v1189_v18  ;;  %v1221_v58 = vld [vmem:[#allocation2 + $0x198] sm:$0xff]  ;;  %v1220_v62 = vld [vmem:[#allocation2 + $0x190] sm:$0xff]  ;;  %v1203_v0 = vld [vmem:[#allocation2 + $0x108] sm:$0xff] }
  0x19   :  { %617 = vmatpush.bf16.msra.mxu3 %v1197_v19  ;;  %v1229_v59 = vld [vmem:[#allocation2 + $0x1d8] sm:$0xff]  ;;  %v1228_v63 = vld [vmem:[#allocation2 + $0x1d0] sm:$0xff]  ;;  %v1211_v1 = vld [vmem:[#allocation2 + $0x148] sm:$0xff] }
  0x1a   :  { %579 = vmatpush.bf16.msra.mxu0 %v1172_v20  ;;  %v1219_v2 = vld [vmem:[#allocation2 + $0x188] sm:$0xff]  ;;  %v1202_v4 = vld [vmem:[#allocation2 + $0x100] sm:$0xff]  ;;  %v48_v10 = vld [vmem:[%s1412_s0 + $0x30] sm:$0xff] }
  0x1b   :  { %592 = vmatpush.bf16.msra.mxu1 %v1180_v21  ;;  %v1227_v3 = vld [vmem:[#allocation2 + $0x1c8] sm:$0xff]  ;;  %v1210_v5 = vld [vmem:[#allocation2 + $0x140] sm:$0xff]  ;;  %v49_v11 = vld [vmem:[%s1412_s0 + $0x38] sm:$0xff]  ;;  %v56_v14 = vpack.c.bf16 %v48_v10, %v48_v10 }
  0x1c   :  { %605 = vmatpush.bf16.msra.mxu2 %v1188_v22  ;;  %v1218_v6 = vld [vmem:[#allocation2 + $0x180] sm:$0xff]  ;;  %v47_v8 = vld [vmem:[%s1412_s0 + $0x28] sm:$0xff]  ;;  %v57_v15 = vpack.c.bf16 %v49_v11, %v49_v11  ;;  %v1241_v16 = vld [vmem:[%s1415_s3 + $0x38] sm:$0xff] }
  0x1d   :  { %618 = vmatpush.bf16.msra.mxu3 %v1196_v23  ;;  %v46_v7 = vld [vmem:[%s1412_s0 + $0x20] sm:$0xff]  ;;  %v55_v13 = vpack.c.bf16 %v47_v8, %v47_v8  ;;  %v1240_v17 = vld [vmem:[%s1415_s3 + $0x30] sm:$0xff]  ;;  %v1239_v18 = vld [vmem:[%s1415_s3 + $0x28] sm:$0xff] }
  0x1e   :  { %580 = vmatpush.bf16.msra.mxu0 %v1171_v24  ;;  %v1226_v9 = vld [vmem:[#allocation2 + $0x1c0] sm:$0xff]  ;;  %v54_v12 = vpack.c.bf16 %v46_v7, %v46_v7  ;;  %v1237_v20 = vld [vmem:[%s1415_s3 + $0x18] sm:$0xff]  ;;  %v1236_v22 = vld [vmem:[%s1415_s3 + $0x10] sm:$0xff] }
  0x1f   :  { %593 = vmatpush.bf16.msra.mxu1 %v1179_v25  ;;  %v1238_v19 = vld [vmem:[%s1415_s3 + $0x20] sm:$0xff]  ;;  %v1235_v24 = vld [vmem:[%s1415_s3 + $0x8] sm:$0xff]  ;;  %v1248_v34 = vld [vmem:[%s1417_s5 + $0x30] sm:$0xff] }
  0x20   :  { %606 = vmatpush.bf16.msra.mxu2 %v1187_v26  ;;  %v1247_v36 = vld [vmem:[%s1417_s5 + $0x28] sm:$0xff] }
  0x21   :  { %619 = vmatpush.bf16.msra.mxu3 %v1195_v27 }
  0x22   :  { %581 = vmatpush.bf16.msra.mxu0 %v1170_v28  ;;  %v1234_v28 = vld [vmem:[%s1415_s3] sm:$0xff] }
  0x23   :  { %594 = vmatpush.bf16.msra.mxu1 %v1178_v29 }
  0x24   :  { %607 = vmatpush.bf16.msra.mxu2 %v1186_v30  ;;  %v1253_v30 = vld [vmem:[%s1414_s2] ss:$0 sm:$0xff] }
  0x25   :  { %620 = vmatpush.bf16.msra.mxu3 %v1194_v31  ;;  %582 = vmatmul.bf16.vlgmr.msra.gmra.mxu0 %v50_v41  ;;  %v1249_v31 = vld [vmem:[%s1417_s5 + $0x38] sm:$0xff] }
  0x26   :  { %626 = vmatpush.bf16.msrb.mxu0 %v1209_v32  ;;  %595 = vmatmul.bf16.vlgmr.msra.gmra.mxu1 %v51_v43 }
  0x27   :  { %639 = vmatpush.bf16.msrb.mxu1 %v1217_v35  ;;  %608 = vmatmul.bf16.vlgmr.msra.gmra.mxu2 %v52_v40  ;;  %v1245_v40 = vld [vmem:[%s1417_s5 + $0x18] sm:$0xff] }
  0x28   :  { %652 = vmatpush.bf16.msrb.mxu2 %v1225_v38  ;;  %621 = vmatmul.bf16.vlgmr.msra.gmra.mxu3 %v53_v42  ;;  %v1246_v38 = vld [vmem:[%s1417_s5 + $0x20] sm:$0xff] }
  0x29   :  { %665 = vmatpush.bf16.msrb.mxu3 %v1233_v39 }
  0x2a   :  { %627 = vmatpush.bf16.msrb.mxu0 %v1208_v44 }
  0x2b   :  { %640 = vmatpush.bf16.msrb.mxu1 %v1216_v45  ;;  %v1244_v45 = vld [vmem:[%s1417_s5 + $0x10] sm:$0xff] }
  0x2c   :  { %653 = vmatpush.bf16.msrb.mxu2 %v1224_v46 }
  0x2d   :  { %666 = vmatpush.bf16.msrb.mxu3 %v1232_v47 }
  0x2e   :  { %628 = vmatpush.bf16.msrb.mxu0 %v1207_v48 }
  0x2f   :  { %641 = vmatpush.bf16.msrb.mxu1 %v1215_v49 }
  0x30   :  { %654 = vmatpush.bf16.msrb.mxu2 %v1223_v50 }
  0x31   :  { %667 = vmatpush.bf16.msrb.mxu3 %v1231_v51 }
  0x32   :  { %629 = vmatpush.bf16.msrb.mxu0 %v1206_v52 }
  0x33   :  { %642 = vmatpush.bf16.msrb.mxu1 %v1214_v53 }
  0x34   :  { %655 = vmatpush.bf16.msrb.mxu2 %v1222_v54 }
  0x35   :  { %668 = vmatpush.bf16.msrb.mxu3 %v1230_v55 }
  0x36   :  { %630 = vmatpush.bf16.msrb.mxu0 %v1205_v56 }
  0x37   :  { %643 = vmatpush.bf16.msrb.mxu1 %v1213_v57  ;;  %v1243_v57 = vld [vmem:[%s1417_s5 + $0x8] sm:$0xff] }
  0x38   :  { %656 = vmatpush.bf16.msrb.mxu2 %v1221_v58  ;;  %v1242_v58 = vld [vmem:[%s1417_s5] sm:$0xff] }
  0x39   :  { %669 = vmatpush.bf16.msrb.mxu3 %v1229_v59  ;;  %v1254_v59 = vld [vmem:[%s1416_s4] ss:$0 sm:$0xff] }
  0x3a   :  { %631 = vmatpush.bf16.msrb.mxu0 %v1204_v60 }
  0x3b   :  { %644 = vmatpush.bf16.msrb.mxu1 %v1212_v61 }
  0x3c   :  { %657 = vmatpush.bf16.msrb.mxu2 %v1220_v62 }
  0x3d   :  { %670 = vmatpush.bf16.msrb.mxu3 %v1228_v63 }
  0x3e   :  { %632 = vmatpush.bf16.msrb.mxu0 %v1203_v0 }
  0x3f   :  { %645 = vmatpush.bf16.msrb.mxu1 %v1211_v1  ;;  %v1255_v1 = vld [vmem:[%s1418_s6] ss:$0 sm:$0xff] }
  0x40   :  { %658 = vmatpush.bf16.msrb.mxu2 %v1219_v2 }
  0x41   :  { %671 = vmatpush.bf16.msrb.mxu3 %v1227_v3 }
  0x42   :  { %633 = vmatpush.bf16.msrb.mxu0 %v1202_v4 }
  0x43   :  { %646 = vmatpush.bf16.msrb.mxu1 %v1210_v5 }
  0x44   :  { %659 = vmatpush.bf16.msrb.mxu2 %v1218_v6 }
  0x45   :  { %672 = vmatpush.bf16.msrb.mxu3 %v1226_v9  ;;  %634 = vmatmul.bf16.vlgmr.msrb.gmra.mxu0 %v54_v12 }
  0x46   :  { %647 = vmatmul.bf16.vlgmr.msrb.gmra.mxu1 %v55_v13  ;;  %748 = vmatpush.bf16.msra.mxu0 %v1241_v16 }
  0x47   :  { %660 = vmatmul.bf16.vlgmr.msrb.gmra.mxu2 %v56_v14  ;;  %831 = vmatpush.bf16.msra.mxu1 %v1249_v31 }
  0x48   :  { %673 = vmatmul.bf16.vlgmr.msrb.gmra.mxu3 %v57_v15 }
  0x4a   :  { %749 = vmatpush.bf16.msra.mxu0 %v1240_v17 }
  0x4b   :  { %832 = vmatpush.bf16.msra.mxu1 %v1248_v34 }
  0x4e   :  { %750 = vmatpush.bf16.msra.mxu0 %v1239_v18 }
  0x4f   :  { %833 = vmatpush.bf16.msra.mxu1 %v1247_v36 }
  0x52   :  { %751 = vmatpush.bf16.msra.mxu0 %v1238_v19 }
  0x53   :  { %834 = vmatpush.bf16.msra.mxu1 %v1246_v38 }
  0x56   :  { %752 = vmatpush.bf16.msra.mxu0 %v1237_v20 }
  0x57   :  { %835 = vmatpush.bf16.msra.mxu1 %v1245_v40 }
  0x5a   :  { %753 = vmatpush.bf16.msra.mxu0 %v1236_v22 }
  0x5b   :  { %836 = vmatpush.bf16.msra.mxu1 %v1244_v45 }
  0x5e   :  { %754 = vmatpush.bf16.msra.mxu0 %v1235_v24 }
  0x5f   :  { %837 = vmatpush.bf16.msra.mxu1 %v1243_v57 }
  0x62   :  { %755 = vmatpush.bf16.msra.mxu0 %v1234_v28 }
  0x63   :  { %838 = vmatpush.bf16.msra.mxu1 %v1242_v58 }
  0xa2   :  { %v583_v21 = vpop.f32.mrf.mxu0 }
  0xa3   :  { %v596_v23 = vpop.f32.mrf.mxu1  ;;  %v584_v35 = vadd.f32 %v1253_v30, %v583_v21 }
  0xa5   :  { %v597_v37 = vadd.f32 %v596_v23, %v584_v35 }
  0xaa   :  { %v609_v25 = vpop.f32.mrf.mxu2  ;;  %v585_v27 = vpop.f32.mrf.mxu0 }
  0xab   :  { %v622_v26 = vpop.f32.mrf.mxu3  ;;  %v598_v29 = vpop.f32.mrf.mxu1  ;;  %v610_v39 = vadd.f32 %v609_v25, %v597_v37 }
  0xad   :  { %v623_v41 = vadd.f32 %v622_v26, %v610_v39 }
  0xb2   :  { %v611_v32 = vpop.f32.mrf.mxu2 }
  0xb3   :  { %v624_v33 = vpop.f32.mrf.mxu3 }
  0xc2   :  { %v635_v42 = vpop.f32.mrf.mxu0 }
  0xc3   :  { %v648_v43 = vpop.f32.mrf.mxu1  ;;  %v636_v44 = vadd.f32 %v635_v42, %v623_v41 }
  0xc5   :  { %v649_v46 = vadd.f32 %v648_v43, %v636_v44 }
  0xca   :  { %v661_v47 = vpop.f32.mrf.mxu2  ;;  %v637_v50 = vpop.f32.mrf.mxu0 }
  0xcb   :  { %v674_v48 = vpop.f32.mrf.mxu3  ;;  %v662_v49 = vadd.f32 %v661_v47, %v649_v46  ;;  %v650_v51 = vpop.f32.mrf.mxu1 }
  0xcd   :  { %v675_v52 = vadd.f32 %v674_v48, %v662_v49 }
  0xcf   :  { %v678_v53 = vmax.f32 %v675_v52, 0.0 }
  0xd1   :  { %v679_v54 = vpack.c.bf16 %v678_v53, %v678_v53 }
  0xd2   :  { %v663_v55 = vpop.f32.mrf.mxu2 }
  0xd3   :  { %v676_v56 = vpop.f32.mrf.mxu3  ;;  %756 = vmatmul.bf16.vlgmr.msra.gmra.mxu0 %v679_v54 }
 0x150   :  { %v757_v60 = vpop.f32.mrf.mxu0 }
 0x151   :  { %v758_v61 = vadd.f32 %v1254_v59, %v757_v60 }
 0x153   :  { %v761_v62 = vmax.f32 %v758_v61, 0.0 }
 0x155   :  { %v762_v63 = vpack.c.bf16 %v761_v62, %v761_v62 }
 0x157   :  { %839 = vmatmul.bf16.vlgmr.msra.gmra.mxu1 %v762_v63 }
 0x158   :  { %v759_v0 = vpop.f32.mrf.mxu0 }
 0x1d4   :  { %v840_v2 = vpop.f32.mrf.mxu1 }
 0x1d5   :  { %v841_v3 = vadd.f32 %v1255_v1, %v840_v2 }
 0x1d7   :  { %844 = vst [vmem:[%s1419_s7] sm:$0xff] %v841_v3 }
 0x1dc   :  { %v842_v4 = vpop.f32.mrf.mxu1 }
 0x1dd   :  { %849 = vsyncpa [#allocation3], 1 }

</bundles_post_ra>
